<compile_context>
chip_gen: v7x
topology: tpu7x:2x2x1
jax: 0.10.0
libtpu: 0.0.40
codegen_flags: <defaults>
</compile_context>

<pallas_src>
import functools

import jax
import jax.numpy as jnp
from jax.experimental import pallas as pl
from jax.experimental.pallas import tpu as pltpu

BN_EPS = 1e-5
LEAKY_SLOPE = 0.2


def conditional_block_kernel(x_ref, c_ref, wfc_ref, wgb_ref, vec_ref,
                             o_ref, acc_ref, *, b_real):
    k = pl.program_id(1)
    n_k = pl.num_programs(1)

    # fc matmul contribution for this (feature-tile, K-tile): bf16 operands,
    # f32 accumulation on the MXU. No fc bias (cancelled by training-mode BN).
    contrib = jnp.dot(x_ref[...], wfc_ref[...], preferred_element_type=jnp.float32)

    @pl.when(k == 0)
    def _():
        acc_ref[...] = contrib

    @pl.when(k != 0)
    def _():
        acc_ref[...] += contrib

    @pl.when(k == n_k - 1)
    def _():
        b_pad, tn = o_ref.shape
        inv_b = 1.0 / b_real
        n_zero_rows = b_pad - b_real

        h = acc_ref[...]                                # (b_pad, tn) f32
        vec = vec_ref[...]                              # packed per-feature vectors
        bn_w, bn_b = vec[0:1, :], vec[1:2, :]
        bg1, bb = vec[2:3, :], vec[3:4, :]              # bg1 = 1 + cond_gamma bias

        # Training-mode BatchNorm1d batch statistics. Centered variance with an
        # exact correction for the zero-padded batch rows (each padded row has
        # h == 0, hence (h - mean)^2 == mean^2). Avoids the E[h^2]-mean^2 form.
        mean = jnp.sum(h, axis=0, keepdims=True) * inv_b
        d = h - mean
        ssq = jnp.sum(d * d, axis=0, keepdims=True)
        if n_zero_rows:
            ssq = ssq - n_zero_rows * (mean * mean)
        var = jnp.maximum(ssq, 0.0) * inv_b

        # BN folded into one per-feature scale/shift -> single (B, tn) FMA.
        scale = jax.lax.rsqrt(var + BN_EPS) * bn_w
        h_bn = d * scale + bn_b

        # FiLM conditioning: one lane-dense (B, 2*tn) matmul -> [gamma | beta].
        gb = jnp.dot(c_ref[...], wgb_ref[...], preferred_element_type=jnp.float32)
        gamma1 = gb[:, :tn] + bg1                       # == 1 + gamma
        beta = gb[:, tn:] + bb

        y = h_bn * gamma1 + beta
        # LeakyReLU(0.2) as max(y, slope*y) (valid for slope in (0, 1)).
        o_ref[...] = jnp.maximum(y, LEAKY_SLOPE * y).astype(o_ref.dtype)


def _pad_cols(a, n):
    pad = n - a.shape[1]
    return jnp.pad(a, ((0, 0), (0, pad))) if pad else a


def _pad_rows(a, n):
    pad = n - a.shape[0]
    return jnp.pad(a, ((0, pad), (0, 0))) if pad else a


def pack_params(p, *, tile_n=None, max_tk=512):
    """Kernel-side parameter layout.

    * feature dim padded to a multiple of tile_n (lane-dense, unmasked stores)
    * fc bias dropped (exactly cancelled by training-mode BatchNorm)
    * cond_gamma / cond_beta weights fused per feature tile as [wg_j | wb_j]
    * bn_w / bn_b / (1 + bg) / bb packed into one (8, out_pad) f32 slab
    * fc weight rows padded to a multiple of tk for the K-axis grid
    """
    in_dim, out_dim = p["wfc"].shape
    cond_dim = p["wg"].shape[0]

    if tile_n is None:
        # 256 fills the 256-wide v6e/v7x MXU for big layers; 128 keeps padding
        # waste low for small layers (and already matches v5e's 128-wide MXU).
        tile_n = 256 if out_dim >= 256 else 128
    assert tile_n % 128 == 0, "feature tile must be lane-dense (multiple of 128)"

    n_tiles = pl.cdiv(out_dim, tile_n)
    out_pad = n_tiles * tile_n

    if in_dim <= max_tk:
        tk, in_pad = in_dim, in_dim
    else:
        tk = max_tk
        in_pad = pl.cdiv(in_dim, tk) * tk

    wfc = _pad_rows(_pad_cols(p["wfc"], out_pad), in_pad).astype(jnp.bfloat16)

    wg = _pad_cols(p["wg"], out_pad).astype(jnp.bfloat16)
    wb = _pad_cols(p["wb"], out_pad).astype(jnp.bfloat16)
    # Per-tile interleaving: columns for tile j are [wg_j | wb_j] so each grid
    # step DMAs one contiguous lane-dense (cond_dim, 2*tile_n) block.
    wgb = jnp.concatenate(
        [wg.reshape(cond_dim, n_tiles, 1, tile_n),
         wb.reshape(cond_dim, n_tiles, 1, tile_n)], axis=2,
    ).reshape(cond_dim, n_tiles * 2 * tile_n)

    # One (8, out_pad) slab for all per-feature vectors (single DMA per step):
    # row 0: bn weight, row 1: bn bias, row 2: 1 + cond_gamma bias (FiLM "+1"
    # folded in), row 3: cond_beta bias, rows 4-7: zero padding to 8 sublanes.
    bn_w = _pad_cols(p["bn_w"].astype(jnp.float32), out_pad)
    bn_b = _pad_cols(p["bn_b"].astype(jnp.float32), out_pad)
    bg1 = _pad_cols(1.0 + p["bg"].astype(jnp.float32), out_pad)
    bb = _pad_cols(p["bb"].astype(jnp.float32), out_pad)
    vec = jnp.concatenate(
        [bn_w, bn_b, bg1, bb, jnp.zeros((4, out_pad), jnp.float32)], axis=0)

    return {
        "wfc": wfc, "wgb": wgb, "vec": vec,
        "in_dim": in_dim, "in_pad": in_pad, "tk": tk,
        "out_dim": out_dim, "out_pad": out_pad, "tile_n": tile_n,
        "cond_dim": cond_dim,
    }


def conditional_block(x, c, packed, *, out_dtype=jnp.float32):
    """ConditionalBlock forward pass as one Pallas kernel.

    Grid: (feature tiles ["parallel" -> megacore on v7x], K tiles ["arbitrary"]).
    The full batch stays resident per feature tile so BatchNorm batch statistics
    are exact. Set out_dtype=jnp.bfloat16 to halve output HBM writeback if the
    consumer tolerates it.
    """
    B, in_dim = x.shape
    cond_dim = c.shape[1]
    assert in_dim == packed["in_dim"] and cond_dim == packed["cond_dim"]

    tile_n = packed["tile_n"]
    out_pad = packed["out_pad"]
    tk = packed["tk"]
    in_pad = packed["in_pad"]
    n_tiles = out_pad // tile_n
    n_k = in_pad // tk

    # bf16 casts hoisted out of the kernel (done once, not per grid step), and
    # the batch zero-padded to the bf16 sublane tile (16) so matmul vregs / MXU
    # rows are fully used. Padded rows are exact zeros: with no fc bias they
    # contribute nothing to h, and the BN variance carries an exact correction.
    B_pad = max(16, ((B + 15) // 16) * 16)
    xb = jnp.pad(x.astype(jnp.bfloat16), ((0, B_pad - B), (0, in_pad - in_dim)))
    cb = jnp.pad(c.astype(jnp.bfloat16), ((0, B_pad - B), (0, 0)))

    # VMEM budget: 2x (double-buffered blocks) + accumulator scratch + headroom,
    # capped at 48 MiB so the design also fits v7x's 64 MiB physical VMEM.
    block_bytes = (
        B_pad * tk * 2                    # x tile (bf16)
        + B_pad * cond_dim * 2            # c (bf16)
        + tk * tile_n * 2                 # wfc tile (bf16)
        + cond_dim * 2 * tile_n * 2       # [wg|wb] tile (bf16)
        + 8 * tile_n * 4                  # packed per-feature vectors (f32)
        + B_pad * tile_n * jnp.dtype(out_dtype).itemsize   # output tile
    )
    scratch_bytes = B_pad * tile_n * 4
    vmem_limit = int(min(max(2 * block_bytes + scratch_bytes + (4 << 20),
                             16 << 20), 48 << 20))

    kernel = functools.partial(conditional_block_kernel, b_real=B)

    out_padded = pl.pallas_call(
        kernel,
        out_shape=jax.ShapeDtypeStruct((B_pad, out_pad), out_dtype),
        grid_spec=pltpu.PrefetchScalarGridSpec(
            num_scalar_prefetch=0,
            grid=(n_tiles, n_k),
            in_specs=[
                pl.BlockSpec((B_pad, tk), lambda j, k: (0, k)),          # x K-tile
                pl.BlockSpec((B_pad, cond_dim), lambda j, k: (0, 0)),    # c (const)
                pl.BlockSpec((tk, tile_n), lambda j, k: (k, j)),         # wfc tile
                pl.BlockSpec((cond_dim, 2 * tile_n), lambda j, k: (0, j)),  # [wg|wb]
                pl.BlockSpec((8, tile_n), lambda j, k: (0, j)),          # packed vecs
            ],
            out_specs=pl.BlockSpec((B_pad, tile_n), lambda j, k: (0, j)),
            scratch_shapes=[pltpu.VMEM((B_pad, tile_n), jnp.float32)],
        ),
        compiler_params=pltpu.CompilerParams(
            dimension_semantics=("parallel", "arbitrary"),
            vmem_limit_bytes=vmem_limit,
        ),
    )(xb, cb, packed["wfc"], packed["wgb"], packed["vec"])

    # Strip batch / feature padding (layout plumbing outside the kernel).
    return out_padded[:B, :packed["out_dim"]]


def init_params(key, in_dim, out_dim, cond_dim):
    """Deterministic synthetic parameter init (PyTorch-like uniform fan-in)."""
    ks = jax.random.split(key, 6)

    def linear_init(kw, kb, fan_in, fan_out):
        bound = 1.0 / jnp.sqrt(jnp.float32(fan_in))
        w = jax.random.uniform(kw, (fan_in, fan_out), jnp.float32, -bound, bound)
        b = jax.random.uniform(kb, (1, fan_out), jnp.float32, -bound, bound)
        return w, b

    wfc, bfc = linear_init(ks[0], ks[1], in_dim, out_dim)
    wg, bg = linear_init(ks[2], ks[3], cond_dim, out_dim)
    wb, bb = linear_init(ks[4], ks[5], cond_dim, out_dim)

    return {
        "wfc": wfc, "bfc": bfc,
        "bn_w": jnp.ones((1, out_dim), jnp.float32),   # BatchNorm1d weight init
        "bn_b": jnp.zeros((1, out_dim), jnp.float32),  # BatchNorm1d bias init
        "wg": wg, "bg": bg,
        "wb": wb, "bb": bb,
    }


def reference_forward(x, c, p, *, matmul_dtype=jnp.float32):
    """Pure-JAX reference of the PyTorch forward (training-mode BN), INCLUDING
    the fc bias. With matmul_dtype=jnp.bfloat16 it uses the kernel's matmul
    precision (bf16 operands, f32 accumulation); matching against it also
    validates that dropping the fc bias under training-mode BN is exact."""
    def mm(a, w):
        return jnp.dot(a.astype(matmul_dtype), w.astype(matmul_dtype),
                       preferred_element_type=jnp.float32)

    h = mm(x, p["wfc"]) + p["bfc"]
    mean = jnp.mean(h, axis=0, keepdims=True)
    var = jnp.mean((h - mean) ** 2, axis=0, keepdims=True)   # biased, like PyTorch
    h = (h - mean) * jax.lax.rsqrt(var + BN_EPS) * p["bn_w"] + p["bn_b"]
    gamma = mm(c, p["wg"]) + p["bg"]
    beta = mm(c, p["wb"]) + p["bb"]
    y = h * (1.0 + gamma) + beta
    return jnp.where(y > 0, y, LEAKY_SLOPE * y)


if __name__ == "__main__":
    # TODO(synk): BatchNorm1d running_mean/running_var momentum updates (training
    # side effect) are not emitted; only the forward normalization is computed.
    in_dim, out_dim, cond_dim = 32, 64, 16
    batch = 8

    key = jax.random.PRNGKey(0)
    kx, kc, kp = jax.random.split(key, 3)
    x = jax.random.normal(kx, (batch, in_dim), jnp.float32)
    c = jax.random.normal(kc, (batch, cond_dim), jnp.float32)
    params = init_params(kp, in_dim, out_dim, cond_dim)
    packed = pack_params(params)

    out = jax.block_until_ready(conditional_block(x, c, packed))
    assert out.shape == (batch, out_dim)

    # Tight check vs a reference using the kernel's matmul precision (bf16
    # operands / f32 accumulation) but with the fc bias applied — also verifies
    # that dropping the bias under training-mode BN is exact.
    ref_mixed = reference_forward(x, c, params, matmul_dtype=jnp.bfloat16)
    assert jnp.allclose(out, ref_mixed, atol=2e-3, rtol=2e-3), "mismatch vs bf16 reference"

    # Sanity check vs the pure-f32 PyTorch-faithful forward: bf16 MXU operands
    # limit fidelity to ~1e-2-level error, so only a coarse bound is asserted.
    ref_f32 = reference_forward(x, c, params, matmul_dtype=jnp.float32)
    max_diff_f32 = float(jnp.max(jnp.abs(out - ref_f32)))
    assert max_diff_f32 < 0.2, f"gross mismatch vs f32 reference ({max_diff_f32})"

    print("KERNEL_OK")
</pallas_src>

<mosaic_0001>
module attributes {stable_mosaic.version = 11 : i64} {
  func.func @conditional_block_kernel(%arg0: i32, %arg1: i32, %arg2: memref<16x32xbf16, #tpu.memory_space<vmem>>, %arg3: memref<16x16xbf16, #tpu.memory_space<vmem>>, %arg4: memref<32x128xbf16, #tpu.memory_space<vmem>>, %arg5: memref<16x256xbf16, #tpu.memory_space<vmem>>, %arg6: memref<8x128xf32, #tpu.memory_space<vmem>>, %arg7: memref<16x128xf32, #tpu.memory_space<vmem>>, %arg8: memref<16x128xf32, #tpu.memory_space<vmem>>) attributes {dimension_semantics = [#tpu.dimension_semantics<parallel>, #tpu.dimension_semantics<arbitrary>], iteration_bounds = array<i64: 1, 1>, scalar_prefetch = 0 : i64, scratch_operands = 1 : i64, tpu.core_type = #tpu.core_type<tc>, window_params = [{transform_indices = @transform_0, window_bounds = array<i64: 16, 32>}, {pipeline_mode = #tpu.pipeline_mode<synchronous>, transform_indices = @transform_1, window_bounds = array<i64: 16, 16>}, {transform_indices = @transform_2, window_bounds = array<i64: 32, 128>}, {transform_indices = @transform_3, window_bounds = array<i64: 16, 256>}, {transform_indices = @transform_4, window_bounds = array<i64: 8, 128>}, {transform_indices = @transform_5, window_bounds = array<i64: 16, 128>}]} {
    %c0 = arith.constant 0 : index
    %c0_0 = arith.constant 0 : index
    %0 = vector.load %arg2[%c0, %c0_0] : memref<16x32xbf16, #tpu.memory_space<vmem>>, vector<16x32xbf16>
    %c0_1 = arith.constant 0 : index
    %c0_2 = arith.constant 0 : index
    %1 = vector.load %arg4[%c0_1, %c0_2] : memref<32x128xbf16, #tpu.memory_space<vmem>>, vector<32x128xbf16>
    %cst = arith.constant dense<0.000000e+00> : vector<16x128xf32>
    %2 = tpu.matmul %0, %1, %cst {dimension_numbers = #tpu.dot_dimension_numbers<[1], [0], [0], [1], [0, 0, 1, 1], [], []>} : vector<16x32xbf16>, vector<32x128xbf16>, vector<16x128xf32> -> vector<16x128xf32>
    %c0_i32 = arith.constant 0 : i32
    %3 = arith.cmpi eq, %arg1, %c0_i32 : i32
    %4 = arith.extui %3 : i1 to i32
    %c0_i32_3 = arith.constant 0 : i32
    %5 = arith.cmpi ne, %4, %c0_i32_3 : i32
    scf.if %5 {
      %c0_8 = arith.constant 0 : index
      %c0_9 = arith.constant 0 : index
      %12 = vector.load %arg8[%c0_8, %c0_9] : memref<16x128xf32, #tpu.memory_space<vmem>>, vector<16x128xf32>
      tpu.vector_store %arg8[%c0_8, %c0_9], %2 {strides = array<i32>} : memref<16x128xf32, #tpu.memory_space<vmem>>, vector<16x128xf32>,
    } else {
    }
    %c0_i32_4 = arith.constant 0 : i32
    %6 = arith.cmpi ne, %arg1, %c0_i32_4 : i32
    %7 = arith.extui %6 : i1 to i32
    %c0_i32_5 = arith.constant 0 : i32
    %8 = arith.cmpi ne, %7, %c0_i32_5 : i32
    scf.if %8 {
      %c0_8 = arith.constant 0 : index
      %c0_9 = arith.constant 0 : index
      %12 = vector.load %arg8[%c0_8, %c0_9] : memref<16x128xf32, #tpu.memory_space<vmem>>, vector<16x128xf32>
      %13 = arith.addf %12, %2 : vector<16x128xf32>
      %c0_10 = arith.constant 0 : index
      %c0_11 = arith.constant 0 : index
      %14 = vector.load %arg8[%c0_10, %c0_11] : memref<16x128xf32, #tpu.memory_space<vmem>>, vector<16x128xf32>
      tpu.vector_store %arg8[%c0_10, %c0_11], %13 {strides = array<i32>} : memref<16x128xf32, #tpu.memory_space<vmem>>, vector<16x128xf32>,
    } else {
    }
    %c0_i32_6 = arith.constant 0 : i32
    %9 = arith.cmpi eq, %arg1, %c0_i32_6 : i32
    %10 = arith.extui %9 : i1 to i32
    %c0_i32_7 = arith.constant 0 : i32
    %11 = arith.cmpi ne, %10, %c0_i32_7 : i32
    scf.if %11 {
      %c0_8 = arith.constant 0 : index
      %c0_9 = arith.constant 0 : index
      %12 = vector.load %arg8[%c0_8, %c0_9] : memref<16x128xf32, #tpu.memory_space<vmem>>, vector<16x128xf32>
      %c0_10 = arith.constant 0 : index
      %c0_11 = arith.constant 0 : index
      %13 = vector.load %arg6[%c0_10, %c0_11] : memref<8x128xf32, #tpu.memory_space<vmem>>, vector<8x128xf32>
      %14 = vector.extract_strided_slice %13 {offsets = [0, 0], sizes = [1, 128], strides = [1, 1]} : vector<8x128xf32> to vector<1x128xf32>
      %15 = vector.extract_strided_slice %13 {offsets = [1, 0], sizes = [1, 128], strides = [1, 1]} : vector<8x128xf32> to vector<1x128xf32>
      %16 = vector.extract_strided_slice %13 {offsets = [2, 0], sizes = [1, 128], strides = [1, 1]} : vector<8x128xf32> to vector<1x128xf32>
      %17 = vector.extract_strided_slice %13 {offsets = [3, 0], sizes = [1, 128], strides = [1, 1]} : vector<8x128xf32> to vector<1x128xf32>
      %cst_12 = arith.constant dense<0.000000e+00> : vector<128xf32>
      %18 = vector.multi_reduction <add>, %12, %cst_12 [0] : vector<16x128xf32> to vector<128xf32>
      %19 = vector.shape_cast %18 : vector<128xf32> to vector<1x128xf32>
      %cst_13 = arith.constant 1.250000e-01 : f32
      %20 = vector.broadcast %cst_13 : f32 to vector<1x128xf32>
      %21 = arith.mulf %19, %20 : vector<1x128xf32>
      %22 = vector.broadcast %21 : vector<1x128xf32> to vector<16x128xf32>
      %23 = arith.subf %12, %22 : vector<16x128xf32>
      %24 = arith.mulf %23, %23 : vector<16x128xf32>
      %cst_14 = arith.constant dense<0.000000e+00> : vector<128xf32>
      %25 = vector.multi_reduction <add>, %24, %cst_14 [0] : vector<16x128xf32> to vector<128xf32>
      %26 = vector.shape_cast %25 : vector<128xf32> to vector<1x128xf32>
      %27 = arith.mulf %21, %21 : vector<1x128xf32>
      %cst_15 = arith.constant 8.000000e+00 : f32
      %28 = vector.broadcast %cst_15 : f32 to vector<1x128xf32>
      %29 = arith.mulf %28, %27 : vector<1x128xf32>
      %30 = arith.subf %26, %29 : vector<1x128xf32>
      %cst_16 = arith.constant 0.000000e+00 : f32
      %31 = vector.broadcast %cst_16 : f32 to vector<1x128xf32>
      %32 = arith.maximumf %30, %31 : vector<1x128xf32>
      %cst_17 = arith.constant 1.250000e-01 : f32
      %33 = vector.broadcast %cst_17 : f32 to vector<1x128xf32>
      %34 = arith.mulf %32, %33 : vector<1x128xf32>
      %cst_18 = arith.constant 9.99999974E-6 : f32
      %35 = vector.broadcast %cst_18 : f32 to vector<1x128xf32>
      %36 = arith.addf %34, %35 : vector<1x128xf32>
      %37 = math.rsqrt %36 : vector<1x128xf32>
      %38 = arith.mulf %37, %14 : vector<1x128xf32>
      %39 = vector.broadcast %38 : vector<1x128xf32> to vector<16x128xf32>
      %40 = arith.mulf %23, %39 : vector<16x128xf32>
      %41 = vector.broadcast %15 : vector<1x128xf32> to vector<16x128xf32>
      %42 = arith.addf %40, %41 : vector<16x128xf32>
      %c0_19 = arith.constant 0 : index
      %c0_20 = arith.constant 0 : index
      %43 = vector.load %arg3[%c0_19, %c0_20] : memref<16x16xbf16, #tpu.memory_space<vmem>>, vector<16x16xbf16>
      %c0_21 = arith.constant 0 : index
      %c0_22 = arith.constant 0 : index
      %44 = vector.load %arg5[%c0_21, %c0_22] : memref<16x256xbf16, #tpu.memory_space<vmem>>, vector<16x256xbf16>
      %cst_23 = arith.constant dense<0.000000e+00> : vector<16x256xf32>
      %45 = tpu.matmul %43, %44, %cst_23 {dimension_numbers = #tpu.dot_dimension_numbers<[1], [0], [0], [1], [0, 0, 1, 1], [], []>} : vector<16x16xbf16>, vector<16x256xbf16>, vector<16x256xf32> -> vector<16x256xf32>
      %46 = vector.extract_strided_slice %45 {offsets = [0, 0], sizes = [16, 128], strides = [1, 1]} : vector<16x256xf32> to vector<16x128xf32>
      %47 = vector.broadcast %16 : vector<1x128xf32> to vector<16x128xf32>
      %48 = arith.addf %46, %47 : vector<16x128xf32>
      %49 = vector.extract_strided_slice %45 {offsets = [0, 128], sizes = [16, 128], strides = [1, 1]} : vector<16x256xf32> to vector<16x128xf32>
      %50 = vector.broadcast %17 : vector<1x128xf32> to vector<16x128xf32>
      %51 = arith.addf %49, %50 : vector<16x128xf32>
      %52 = arith.mulf %42, %48 : vector<16x128xf32>
      %53 = arith.addf %52, %51 : vector<16x128xf32>
      %cst_24 = arith.constant 2.000000e-01 : f32
      %54 = vector.broadcast %cst_24 : f32 to vector<16x128xf32>
      %55 = arith.mulf %54, %53 : vector<16x128xf32>
      %56 = arith.maximumf %53, %55 : vector<16x128xf32>
      %c0_25 = arith.constant 0 : index
      %c0_26 = arith.constant 0 : index
      %57 = vector.load %arg7[%c0_25, %c0_26] : memref<16x128xf32, #tpu.memory_space<vmem>>, vector<16x128xf32>
      tpu.vector_store %arg7[%c0_25, %c0_26], %56 {strides = array<i32>} : memref<16x128xf32, #tpu.memory_space<vmem>>, vector<16x128xf32>,
    } else {
    }
    return
  }
  func.func @transform_0(%arg0: i32, %arg1: i32) -> (i32, i32) {
    %c0_i32 = arith.constant 0 : i32
    %c0_i32_0 = arith.constant 0 : i32
    return %c0_i32, %arg1 : i32, i32
  }
  func.func @transform_1(%arg0: i32, %arg1: i32) -> (i32, i32) {
    %c0_i32 = arith.constant 0 : i32
    %c0_i32_0 = arith.constant 0 : i32
    %c0_i32_1 = arith.constant 0 : i32
    return %c0_i32, %c0_i32_0 : i32, i32
  }
  func.func @transform_2(%arg0: i32, %arg1: i32) -> (i32, i32) {
    %c0_i32 = arith.constant 0 : i32
    return %arg1, %arg0 : i32, i32
  }
  func.func @transform_3(%arg0: i32, %arg1: i32) -> (i32, i32) {
    %c0_i32 = arith.constant 0 : i32
    %c0_i32_0 = arith.constant 0 : i32
    return %c0_i32, %arg0 : i32, i32
  }
  func.func @transform_4(%arg0: i32, %arg1: i32) -> (i32, i32) {
    %c0_i32 = arith.constant 0 : i32
    %c0_i32_0 = arith.constant 0 : i32
    return %c0_i32, %arg0 : i32, i32
  }
  func.func @transform_5(%arg0: i32, %arg1: i32) -> (i32, i32) {
    %c0_i32 = arith.constant 0 : i32
    %c0_i32_0 = arith.constant 0 : i32
    return %c0_i32, %arg0 : i32, i32
  }
}

</mosaic_0001>

<bundles_post_ra>
// kernel: tpu_custom_call.1
= control target key start
LH: loop header
LB: loop body
LE: loop exit
PB: predicated region body
PF: predicated region fallthrough
CT: control target
= control target key end

     0   :  { %10 = vsyncpa [#allocation4], 0  ;;  %s605_s0 = inlined_call_operand.hbm [shape: bf16[16,32], index: 0, kind: input, shape index: {}]   ;;  %s606_s1 = inlined_call_operand.hbm [shape: bf16[16,16], index: 1, kind: input, shape index: {}]   ;;  %s607_s2 = inlined_call_operand.hbm [shape: bf16[32,128], index: 2, kind: input, shape index: {}]   ;;  %s608_s3 = inlined_call_operand.hbm [shape: bf16[16,256], index: 3, kind: input, shape index: {}]   ;;  %s609_s4 = inlined_call_operand.vmem [shape: f32[8,128], index: 4, kind: input, shape index: {}]   ;;  %s610_s5 = inlined_call_operand.hbm [shape: f32[16,128], index: 5, kind: output, shape index: {}]  }
   0x1   :  { %11 = vsyncpa [#allocation7], 0 }
   0x2   :  { %12 = vsyncpa [#allocation10], 0 }
   0x3   :  { %13 = vsyncpa [#allocation5], 0  ;;  %s471_s18 = smov [#allocation6]   ;;  %s472_s20 = smov [#allocation3]  }
   0x4   :  { %s31_s19 = sshll.u32 %s471_s18, 4  ;;  %s19_s21 = sshll.u32 %s472_s20, 4  ;;  %s32_s19 = int_to_ptr.vmem [resolvable:$true] %s31_s19  ;;  %s513_s21 = int_to_ptr.vmem [resolvable:$true] %s19_s21 }
   0x5   :  { %s353_s24 = scalar_lea.hbm %s606_s1, 128 }
   0x6   :  { %p354_p0 = scmp.ne.s32.totalorder %s606_s1, %s353_s24  ;;  %p357_p1 = scmp.lt.u32.totalorder %s353_s24, %s606_s1 }
   0x8   :  { %p359_p2 = pnand %p357_p1, %p354_p0 }
   0xa   :  { %362 = shalt.err (!%p359_p2)
}
   0xb   :  { %s363_s29 = scalar_lea.vmem %s32_s19, 128  ;;  %p368_p4 = scmp.lt.s32.totalorder %s32_s19, %s32_s19 }
   0xc   :  { %p364_p3 = scmp.ne.s32.totalorder %s32_s19, %s363_s29  ;;  %p369_p5 = scmp.lt.s32.totalorder %s363_s29, %s363_s29 }
   0xe   :  { %p370_p6 = por %p369_p5, %p368_p4 }
  0x10   :  { %p371_p7 = pnand %p370_p6, %p364_p3 }
  0x12   :  { %374 = shalt.err (!%p371_p7)
}
  0x13   :  { %s473_s30 = smov 64   ;;  %s474_s6 = smov 4  }
  0x14   :  { %37 = dma.hbm_to_vmem [thread:$0]  %s606_s1, 128, %s32_s19, [#allocation7], %s473_s30, %s473_s30, %s474_s6  }
  0x15   :  { %s375_s11 = scalar_lea.hbm %s605_s0, 128 }
  0x16   :  { %p376_p8 = scmp.ne.s32.totalorder %s605_s0, %s375_s11  ;;  %p379_p9 = scmp.lt.u32.totalorder %s375_s11, %s605_s0 }
  0x18   :  { %p381_p10 = pnand %p379_p9, %p376_p8 }
  0x1a   :  { %384 = shalt.err (!%p381_p10)
}
  0x1b   :  { %s385_s16 = scalar_lea.vmem %s513_s21, 128  ;;  %p390_p12 = scmp.lt.s32.totalorder %s513_s21, %s513_s21 }
  0x1c   :  { %p386_p11 = scmp.ne.s32.totalorder %s513_s21, %s385_s16  ;;  %p391_p13 = scmp.lt.s32.totalorder %s385_s16, %s385_s16 }
  0x1e   :  { %p392_p0 = por %p391_p13, %p390_p12 }
  0x20   :  { %p393_p1 = pnand %p392_p0, %p386_p11 }
  0x22   :  { %396 = shalt.err (!%p393_p1)
}
  0x23   :  { %25 = dma.hbm_to_vmem [thread:$0]  %s605_s0, 128, %s513_s21, [#allocation4], %s473_s30, %s473_s30, %s474_s6  }
  0x24   :  { %s475_s18 = smov [#allocation8]   ;;  %s476_s20 = smov [#allocation9]  }
  0x25   :  { %s43_s19 = sshll.u32 %s475_s18, 4  ;;  %s55_s22 = sshll.u32 %s476_s20, 4  ;;  %s44_s19 = int_to_ptr.vmem [resolvable:$true] %s43_s19  ;;  %s550_s22 = int_to_ptr.vmem [resolvable:$true] %s55_s22 }
  0x26   :  { %s397_s25 = scalar_lea.hbm %s607_s2, 256 }
  0x27   :  { %p398_p2 = scmp.ne.s32.totalorder %s607_s2, %s397_s25  ;;  %p401_p3 = scmp.lt.u32.totalorder %s397_s25, %s607_s2 }
  0x29   :  { %p403_p4 = pnand %p401_p3, %p398_p2 }
  0x2b   :  { %406 = shalt.err (!%p403_p4)
}
  0x2c   :  { %s407_s0 = scalar_lea.vmem %s44_s19, 256  ;;  %p412_p6 = scmp.lt.s32.totalorder %s44_s19, %s44_s19 }
  0x2d   :  { %p408_p5 = scmp.ne.s32.totalorder %s44_s19, %s407_s0  ;;  %p413_p7 = scmp.lt.s32.totalorder %s407_s0, %s407_s0 }
  0x2f   :  { %p414_p8 = por %p413_p7, %p412_p6 }
  0x31   :  { %p415_p9 = pnand %p414_p8, %p408_p5 }
  0x33   :  { %418 = shalt.err (!%p415_p9)
}
  0x34   :  { %49 = dma.hbm_to_vmem [thread:$0]  %s607_s2, 256, %s44_s19, [#allocation7], %s473_s30, %s473_s30, %s474_s6  }
  0x35   :  { %s419_s10 = scalar_lea.hbm %s608_s3, 256 }
  0x36   :  { %p420_p10 = scmp.ne.s32.totalorder %s608_s3, %s419_s10  ;;  %p423_p11 = scmp.lt.u32.totalorder %s419_s10, %s608_s3 }
  0x38   :  { %p425_p12 = pnand %p423_p11, %p420_p10 }
  0x3a   :  { %428 = shalt.err (!%p425_p12)
}
  0x3b   :  { %s429_s15 = scalar_lea.vmem %s550_s22, 256  ;;  %p434_p0 = scmp.lt.s32.totalorder %s550_s22, %s550_s22 }
  0x3c   :  { %p430_p13 = scmp.ne.s32.totalorder %s550_s22, %s429_s15  ;;  %p435_p1 = scmp.lt.s32.totalorder %s429_s15, %s429_s15 }
  0x3e   :  { %p436_p2 = por %p435_p1, %p434_p0 }
  0x40   :  { %p437_p3 = pnand %p436_p2, %p430_p13 }
  0x42   :  { %440 = shalt.err (!%p437_p3)
}
  0x43   :  { %s477_s2 = smov 128   ;;  %s478_s30 = smov 8  }
  0x44   :  { %61 = dma.hbm_to_vmem [thread:$0]  %s608_s3, 256, %s550_s22, [#allocation10], %s477_s2, %s477_s2, %s478_s30  }
  0x45   :  { %463 = dma.done.wait [#allocation4], 128  }
  0x46   :  { %464 = vsyncadd [#allocation4], 4294967168 }
  0x47   :  { %465 = dma.done.wait [#allocation7], 384  }
  0x48   :  { %466 = vsyncadd [#allocation7], 4294966912 }
  0x49   :  { %467 = dma.done.wait [#allocation10], 256  }
  0x4a   :  { %468 = vsyncadd [#allocation10], 4294967040  ;;  %v479_v0 = vmov 0.0   ;;  %vm480_vm0 = vmmov 0   ;;  %v481_v1 = vmov 0   ;;  %v344_v2 = vld [vmem:[#allocation8] sm:$0xff]   ;;  %v194_v41 = vlaneseq }
  0x4b   :  { %324 = vmatprep.subr.bf16.mxu0 %v479_v0  ;;  %328 = vmatprep.mubr.msk.bf16.mxu0 %vm480_vm0, %v479_v0  ;;  %v345_v3 = vld [vmem:[#allocation8 + $0x8] sm:$0xff]   ;;  %v347_v4 = vld [vmem:[#allocation9 + $0x4] ss:$8 sps:$4 sm:$0xff]   ;;  %v349_v5 = vld [vmem:[#allocation9] ss:$8 sps:$4 sm:$0xff]   ;;  %vm100_vm1 = vcmask 261120  }
  0x4c   :  { %261 = vmatprep.mubr.bf16.mxu1 %v481_v1  ;;  %325 = vmatpush3.bf16.msra.mxu0 %v344_v2  ;;  %v346_v6 = vld [vmem:[#allocation3] sm:$0xff]   ;;  %v350_v7 = vld [vmem:[#allocation6] sm:$0xff]   ;;  %vm225_vm2 = vcmask 130048   ;;  %v195_v42 = vshrl.u32 %v194_v41, 7 }
  0x4d   :  { %326 = vmatprep.subr.bf16.mxu0 %v479_v0  ;;  %229 = vmatprep.subr.bf16.mxu1 %v347_v4  ;;  %v166_v43 = vld [vmem:[%s609_s4] sm:$0xff]  ;;  %s482_s4 = smov [#allocation11]  }
  0x4e   :  { %230 = vmatpush1.bf16.msra.mxu1 %v349_v5  ;;  %v196_v44 = vsub.s32 0, %v195_v42  ;;  %v202_v45 = vsub.s32 1, %v195_v42  ;;  %v274_v46 = vsub.s32 2, %v195_v42  ;;  %v280_v49 = vsub.s32 3, %v195_v42  ;;  %s299_s17 = sshll.u32 %s482_s4, 4  ;;  %s300_s17 = int_to_ptr.vmem [resolvable:$true] %s299_s17 }
  0x4f   :  { %s441_s18 = scalar_lea.vmem %s300_s17, 256  ;;  %p446_p5 = scmp.lt.s32.totalorder %s300_s17, %s300_s17 }
  0x50   :  { %327 = vmatpush3.bf16.msra.mxu0 %v345_v3  ;;  %v203_v51 = vrot.slane %v166_v43, %v202_v45  ;;  %v275_v52 = vrot.slane %v166_v43, %v274_v46  ;;  %v281_v55 = vrot.slane %v166_v43, %v280_v49  ;;  %p442_p4 = scmp.ne.s32.totalorder %s300_s17, %s441_s18  ;;  %p447_p6 = scmp.lt.s32.totalorder %s441_s18, %s441_s18 }
  0x51   :  { %320 = vmatmul.mubr.msk.bf16.vlgmr.msra.gmra.mrb[0].mxu1 %vm225_vm2, %v350_v7 }
  0x52   :  { %p448_p7 = por %p447_p6, %p446_p5 }
  0x53   :  { %329 = vmatmul.mubr.msk.bf16.vlgmr.msra.gmra.mrb[0].mxu0 %vm100_vm1, %v346_v6 }
  0x54   :  { %p449_p8 = pnand %p448_p7, %p442_p4 }
 0x124   :  { %v263_v9 = vpop.f32.mrb[0].mxu1 }
 0x125   :  { %v265_v11 = vpop.f32.mrb[1].mxu1  ;;  %v276_v57 = vadd.f32 %v275_v52, %v263_v9 }
 0x126   :  { %v138_v8 = vpop.f32.mrb[0].mxu0  ;;  %v267_v13 = vpop.f32.mrb[2].mxu1  ;;  %v282_v61 = vadd.f32 %v281_v55, %v265_v11 }
 0x127   :  { %v330_v10 = vpop.f32.mrb[1].mxu0  ;;  %v269_v16 = vpop.f32.mrb[3].mxu1  ;;  %v277_v59 = vadd.f32 %v275_v52, %v267_v13 }
 0x128   :  { %v141_v12 = vpop.f32.mrb[2].mxu0  ;;  %v283_v63 = vadd.f32 %v281_v55, %v269_v16 }
 0x129   :  { %v167_v14 = vadd.f32 %v141_v12, %v138_v8  ;;  %v331_v15 = vpop.f32.mrb[3].mxu0 }
 0x12b   :  { %v168_v17 = vrot.slane %v167_v14, 4 }
 0x12d   :  { %v169_v18 = vadd.f32 %v168_v17, %v167_v14 }
 0x12f   :  { %v170_v19 = vrot.slane %v169_v18, 2 }
 0x131   :  { %v171_v20 = vadd.f32 %v170_v19, %v169_v18 }
 0x133   :  { %v172_v21 = vrot.slane %v171_v20, 1 }
 0x135   :  { %v173_v22 = vadd.f32 %v172_v21, %v171_v20 }
 0x137   :  { %v174_v23 = vmul.f32 0.125, %v173_v22 }
 0x139   :  { %v175_v24 = vsub.f32 %v138_v8, %v174_v23  ;;  %v176_v25 = vsub.f32 %v141_v12, %v174_v23  ;;  %v186_v33 = vmul.f32 %v174_v23, %v174_v23 }
 0x13b   :  { %v177_v26 = vmul.f32 %v175_v24, %v175_v24  ;;  %v178_v27 = vmul.f32 %v176_v25, %v176_v25  ;;  %v187_v36 = vmul.f32 8.0, %v186_v33 }
 0x13d   :  { %v179_v28 = vadd.f32 %v178_v27, %v177_v26 }
 0x13f   :  { %v180_v29 = vrot.slane %v179_v28, 4 }
 0x141   :  { %v181_v30 = vadd.f32 %v180_v29, %v179_v28 }
 0x143   :  { %v182_v31 = vrot.slane %v181_v30, 2 }
 0x145   :  { %v183_v32 = vadd.f32 %v182_v31, %v181_v30 }
 0x147   :  { %v184_v34 = vrot.slane %v183_v32, 1 }
 0x149   :  { %v185_v35 = vadd.f32 %v184_v34, %v183_v32 }
 0x14b   :  { %v188_v37 = vsub.f32 %v185_v35, %v187_v36 }
 0x14d   :  { %v189_v38 = vmax.f32 %v188_v37, 0.0 }
 0x14f   :  { %v190_v39 = vmul.f32 0.125, %v189_v38 }
 0x151   :  { %v191_v40 = vadd.f32 1e-05, %v190_v39 }
 0x153   :  { %351 = vrsqrt.f32 %v191_v40 }
 0x15d   :  { %v352_v47 = vpop.eup %351 }
 0x15e   :  { %v193_v48 = vmul.f32 %v352_v47, %v166_v43 }
 0x160   :  { %v197_v50 = vrot.slane %v193_v48, %v196_v44 }
 0x162   :  { %v199_v53 = vmul.f32 %v197_v50, %v176_v25  ;;  %v198_v54 = vmul.f32 %v197_v50, %v175_v24 }
 0x164   :  { %v204_v56 = vadd.f32 %v203_v51, %v198_v54  ;;  %v205_v58 = vadd.f32 %v203_v51, %v199_v53 }
 0x166   :  { %v284_v60 = vmul.f32 %v276_v57, %v204_v56  ;;  %v285_v62 = vmul.f32 %v277_v59, %v205_v58 }
 0x168   :  { %v286_v0 = vadd.f32 %v284_v60, %v282_v61  ;;  %v287_v1 = vadd.f32 %v285_v62, %v283_v63 }
 0x16a   :  { %v288_v2 = vmul.f32 0.2, %v286_v0  ;;  %v289_v3 = vmul.f32 0.2, %v287_v1 }
 0x16c   :  { %v290_v4 = vmax.f32 %v286_v0, %v288_v2  ;;  %v291_v5 = vmax.f32 %v287_v1, %v289_v3 }
 0x16e   :  { %292 = vst [vmem:[#allocation11] sm:$0xff] %v290_v4  ;;  %293 = vst [vmem:[#allocation11 + $0x8] sm:$0xff] %v291_v5 }
 0x16f   :  { %452 = shalt.err (!%p449_p8)
}
 0x170   :  { %s453_s22 = scalar_lea.hbm %s610_s5, 256 }
 0x171   :  { %p454_p9 = scmp.ne.s32.totalorder %s610_s5, %s453_s22  ;;  %p457_p10 = scmp.lt.u32.totalorder %s453_s22, %s610_s5 }
 0x173   :  { %p459_p11 = pnand %p457_p10, %p454_p9 }
 0x175   :  { %462 = shalt.err (!%p459_p11)
}
 0x176   :  { %305 = dma.vmem_to_hbm [thread:$0]  %s300_s17, 256, %s610_s5, [#allocation5], %s477_s2, %s477_s2, %s478_s30  }
 0x177   :  { %469 = dma.done.wait [#allocation5], 256  }
 0x178   :  { %470 = vsyncadd [#allocation5], 4294967040 }
 0x179   :  { %309 = vsyncpa [#allocation4], 1 }
 0x17a   :  { %310 = vsyncpa [#allocation7], 1 }
 0x17b   :  { %311 = vsyncpa [#allocation10], 1 }
 0x17c   :  { %312 = vsyncpa [#allocation5], 1 }

</bundles_post_ra>
